<compile_context>
chip_gen: v5e
topology: v5e:2x2
jax: 0.10.0
libtpu: 0.0.40
codegen_flags: <defaults>
</compile_context>

<pallas_src>
import functools

import jax
import jax.numpy as jnp
from jax.experimental import pallas as pl
from jax.experimental.pallas import tpu as pltpu

_LANE = 128
_MiB = 1024 * 1024
# Absolute cap on the spatial (lane) tile: keeps each grid step's DMA several
# MiB (per-step ~0.35us overhead becomes <10% of wall) without collapsing the
# double-buffer pipeline depth.
_ABS_MAX_TILE_S = 65536


def _vmem_capacity_bytes():
    """Per-core VMEM capacity; conservative fallback if the query fails."""
    try:
        return int(pltpu.get_tpu_info().vmem_capacity_bytes)
    except Exception:
        return 64 * _MiB  # v7x per-TensorCore size (smallest current gen)


def _pick_spatial_tile(s, c_in, c_out, itemsize, vmem_cap, max_tile_s=None):
    """Pick the spatial (lane) tile size for the 1x1-conv kernel."""
    if max_tile_s is None:
        # Budget: <= half of per-core VMEM and <= 48 MiB for the streamed,
        # double-buffered x/out tiles plus f32 accumulator temporaries.
        budget = min(vmem_cap // 2, 48 * _MiB)
        per_lane = itemsize * 2 * (c_in + c_out) + 4 * 2 * c_out
        max_tile_s = min(_ABS_MAX_TILE_S, budget // per_lane)
    max_tile_s = max(_LANE, (int(max_tile_s) // _LANE) * _LANE)
    if s <= max_tile_s:
        return s  # a block equal to the full extent is always legal
    # Prefer a multiple of 128 that divides S: every store stays lane-dense
    # and every DMA is full-size (no ragged tail).
    for cand in range(max_tile_s, 0, -_LANE):
        if s % cand == 0:
            return cand
    # No divisor: fall back to the cap; the boundary block is masked by Pallas.
    return max_tile_s


def _conv1x1_kernel(x_ref, w_ref, b_ref, o_ref, *, apply_sigmoid):
    # x_ref: (1, C_in, TS)   w_ref: (C_out, C_in)   b_ref: (C_out, 1)
    # o_ref: (1, C_out, TS)  -- the spatial tile TS is the lane dimension, so
    # output stores are lane-dense whenever TS % 128 == 0 (or TS == S).
    acc = jnp.dot(
        w_ref[...],
        x_ref[0],
        preferred_element_type=jnp.float32,
        precision=jax.lax.Precision.HIGHEST,
    )
    acc = acc + b_ref[...]
    if apply_sigmoid:
        acc = jax.nn.sigmoid(acc)
    o_ref[0] = acc.astype(o_ref.dtype)


def out_conv(x, weight, bias, *, apply_sigmoid=False, max_tile_s=None):
    """nn.Conv2d(in_ch, out_ch, 1) forward (optionally fused with sigmoid).

    x:      (N, C_in, H, W)   NCHW (PyTorch convention)
    weight: (C_out, C_in, 1, 1)
    bias:   (C_out,)
    returns (N, C_out, H, W)
    """
    N, C_in, H, W = x.shape
    C_out = weight.shape[0]
    S = H * W
    itemsize = jnp.dtype(x.dtype).itemsize

    x3 = x.reshape(N, C_in, S)                 # pure reshape, no transpose
    w2 = weight.reshape(C_out, C_in).astype(jnp.float32)
    b2 = bias.reshape(C_out, 1).astype(jnp.float32)

    vmem_cap = _vmem_capacity_bytes()
    ts = _pick_spatial_tile(S, C_in, C_out, itemsize, vmem_cap, max_tile_s)
    grid = (N, pl.cdiv(S, ts))

    # Explicit scoped-VMEM limit: double-buffered x/out tiles + f32 temps,
    # with 2x headroom for Mosaic internals, clamped under the physical size.
    per_lane = itemsize * 2 * (C_in + C_out) + 4 * 2 * C_out
    working = per_lane * ts + 2 * _MiB
    vmem_limit = int(min(vmem_cap - 16 * _MiB, max(48 * _MiB, 2 * working)))

    cost = pl.CostEstimate(
        flops=2 * N * S * C_in * C_out,
        transcendentals=(N * S * C_out) if apply_sigmoid else 0,
        bytes_accessed=itemsize * (N * S * C_in + N * S * C_out)
        + 4 * (C_in * C_out + C_out),
    )

    out3 = pl.pallas_call(
        functools.partial(_conv1x1_kernel, apply_sigmoid=apply_sigmoid),
        out_shape=jax.ShapeDtypeStruct((N, C_out, S), x.dtype),
        grid=grid,
        in_specs=[
            pl.BlockSpec((1, C_in, ts), lambda n, s: (n, 0, s)),
            pl.BlockSpec((C_out, C_in), lambda n, s: (0, 0)),   # VMEM-resident
            pl.BlockSpec((C_out, 1), lambda n, s: (0, 0)),      # VMEM-resident
        ],
        out_specs=pl.BlockSpec((1, C_out, ts), lambda n, s: (n, 0, s)),
        compiler_params=pltpu.CompilerParams(
            dimension_semantics=("parallel", "parallel"),
            vmem_limit_bytes=vmem_limit,
        ),
        cost_estimate=cost,
    )(x3, w2, b2)

    return out3.reshape(N, C_out, H, W)


def depth_to_space(x, block_size):
    """Matches the module's DepthToSpace exactly:
    out[b, c, h*bs + i, w*bs + j] = x[b, (i*bs + j)*s_depth + c, h, w]."""
    N, D, H, W = x.shape
    bs = block_size
    s_depth = D // (bs * bs)
    y = x.reshape(N, bs, bs, s_depth, H, W)      # (b, i, j, c, h, w)
    y = jnp.transpose(y, (0, 3, 4, 1, 5, 2))     # (b, c, h, i, w, j)
    return y.reshape(N, s_depth, H * bs, W * bs)


def unet_head(x, weight, bias, *, block_size=2):
    """UNet tail: OutConv (1x1 conv) -> DepthToSpace -> sigmoid.

    Sigmoid commutes with the DepthToSpace permutation, so it is fused into
    the Pallas conv kernel; DepthToSpace stays wrapper-side layout plumbing.
    """
    # TODO(synk): the UNet encoder/decoder (DoubleConv 3x3 convs, MaxPool2d,
    # ConvTranspose2d, skip concatenations) and an in-kernel DepthToSpace
    # (stride-2 lane interleave) are not implemented as Pallas kernels here.
    y = out_conv(x, weight, bias, apply_sigmoid=True)
    return depth_to_space(y, block_size)


def _conv_sigmoid_ref(x, weight, bias):
    c_out = weight.shape[0]
    ref = jnp.einsum("nchw,oc->nohw", x, weight.reshape(c_out, -1),
                     precision=jax.lax.Precision.HIGHEST)
    return jax.nn.sigmoid(ref + bias[None, :, None, None])


if __name__ == "__main__":
    key = jax.random.PRNGKey(0)
    k_x, k_w, k_b = jax.random.split(key, 3)

    # UNet head shapes: outc = nn.Conv2d(32, 12, 1), d2s = DepthToSpace(2).
    N, C_in, C_out, H, W = 2, 32, 12, 16, 16
    block = 2

    x = jax.random.normal(k_x, (N, C_in, H, W), dtype=jnp.float32)
    weight = jax.random.normal(k_w, (C_out, C_in, 1, 1), dtype=jnp.float32) * 0.1
    bias = jax.random.normal(k_b, (C_out,), dtype=jnp.float32) * 0.1

    # --- main test: full head (conv + sigmoid kernel, wrapper DepthToSpace) ---
    y = jax.block_until_ready(unet_head(x, weight, bias, block_size=block))

    ref = jnp.einsum("nchw,oc->nohw", x, weight.reshape(C_out, C_in),
                     precision=jax.lax.Precision.HIGHEST)
    ref = ref + bias[None, :, None, None]
    ref = depth_to_space(ref, block)
    ref = jax.nn.sigmoid(ref)

    assert y.shape == (N, C_out // (block * block), H * block, W * block)
    # Tolerance deliberately independent of MXU f32 emulation-pass details.
    assert jnp.allclose(y, ref, atol=1e-4, rtol=1e-4), \
        float(jnp.max(jnp.abs(y - ref)))

    # --- multi-tile path (tile divides S, grid has 2 spatial steps) ---
    x2 = jax.random.normal(key, (1, C_in, 16, 32), dtype=jnp.float32)
    y2 = jax.block_until_ready(
        out_conv(x2, weight, bias, apply_sigmoid=True, max_tile_s=256))
    assert jnp.allclose(y2, _conv_sigmoid_ref(x2, weight, bias),
                        atol=1e-4, rtol=1e-4)

    # --- ragged path (S=400 not divisible by the 384 tile; boundary masked) ---
    x3 = jax.random.normal(key, (1, C_in, 20, 20), dtype=jnp.float32)
    y3 = jax.block_until_ready(
        out_conv(x3, weight, bias, apply_sigmoid=True, max_tile_s=384))
    assert jnp.allclose(y3, _conv_sigmoid_ref(x3, weight, bias),
                        atol=1e-4, rtol=1e-4)

    print("KERNEL_OK")
</pallas_src>

<mosaic_0001>
module attributes {stable_mosaic.version = 11 : i64} {
  func.func @_conv1x1_kernel(%arg0: i32, %arg1: i32, %arg2: memref<1x32x256xf32, #tpu.memory_space<vmem>>, %arg3: memref<12x32xf32, #tpu.memory_space<vmem>>, %arg4: memref<12x1xf32, #tpu.memory_space<vmem>>, %arg5: memref<1x12x256xf32, #tpu.memory_space<vmem>>) attributes {dimension_semantics = [#tpu.dimension_semantics<parallel>, #tpu.dimension_semantics<parallel>], iteration_bounds = array<i64: 2, 1>, scalar_prefetch = 0 : i64, scratch_operands = 0 : i64, tpu.core_type = #tpu.core_type<tc>, window_params = [{transform_indices = @transform_0, window_bounds = array<i64: 1, 32, 256>}, {pipeline_mode = #tpu.pipeline_mode<synchronous>, transform_indices = @transform_1, window_bounds = array<i64: 12, 32>}, {pipeline_mode = #tpu.pipeline_mode<synchronous>, transform_indices = @transform_2, window_bounds = array<i64: 12, 1>}, {transform_indices = @transform_3, window_bounds = array<i64: 1, 12, 256>}]} {
    %c0 = arith.constant 0 : index
    %c0_0 = arith.constant 0 : index
    %0 = vector.load %arg3[%c0, %c0_0] : memref<12x32xf32, #tpu.memory_space<vmem>>, vector<12x32xf32>
    %c0_1 = arith.constant 0 : index
    %c0_2 = arith.constant 0 : index
    %c0_3 = arith.constant 0 : index
    %1 = vector.load %arg2[%c0_1, %c0_2, %c0_3] : memref<1x32x256xf32, #tpu.memory_space<vmem>>, vector<1x32x256xf32>
    %2 = vector.shape_cast %1 : vector<1x32x256xf32> to vector<32x256xf32>
    %cst = arith.constant dense<0.000000e+00> : vector<12x256xf32>
    %3 = tpu.matmul %0, %2, %cst {dimension_numbers = #tpu.dot_dimension_numbers<[1], [0], [0], [1], [0, 0, 1, 1], [], []>, precision = #tpu.contract_precision<fp32>} : vector<12x32xf32>, vector<32x256xf32>, vector<12x256xf32> -> vector<12x256xf32>
    %c0_4 = arith.constant 0 : index
    %c0_5 = arith.constant 0 : index
    %4 = vector.load %arg4[%c0_4, %c0_5] : memref<12x1xf32, #tpu.memory_space<vmem>>, vector<12x1xf32>
    %5 = vector.broadcast %4 : vector<12x1xf32> to vector<12x256xf32>
    %6 = arith.addf %3, %5 : vector<12x256xf32>
    %7 = arith.negf %6 : vector<12x256xf32>
    %8 = math.exp %7 : vector<12x256xf32>
    %cst_6 = arith.constant 1.000000e+00 : f32
    %9 = vector.broadcast %cst_6 : f32 to vector<12x256xf32>
    %10 = arith.addf %9, %8 : vector<12x256xf32>
    %11 = arith.divf %9, %10 : vector<12x256xf32>
    %c0_7 = arith.constant 0 : index
    %c0_8 = arith.constant 0 : index
    %c0_9 = arith.constant 0 : index
    %12 = vector.load %arg5[%c0_7, %c0_8, %c0_9] : memref<1x12x256xf32, #tpu.memory_space<vmem>>, vector<1x12x256xf32>
    %13 = vector.shape_cast %12 : vector<1x12x256xf32> to vector<12x256xf32>
    %14 = vector.shape_cast %11 : vector<12x256xf32> to vector<1x12x256xf32>
    tpu.vector_store %arg5[%c0_7, %c0_8, %c0_9], %14 {strides = array<i32>} : memref<1x12x256xf32, #tpu.memory_space<vmem>>, vector<1x12x256xf32>,
    return
  }
  func.func @transform_0(%arg0: i32, %arg1: i32) -> (i32, i32, i32) {
    %c0_i32 = arith.constant 0 : i32
    %c0_i32_0 = arith.constant 0 : i32
    return %arg0, %c0_i32, %arg1 : i32, i32, i32
  }
  func.func @transform_1(%arg0: i32, %arg1: i32) -> (i32, i32) {
    %c0_i32 = arith.constant 0 : i32
    %c0_i32_0 = arith.constant 0 : i32
    %c0_i32_1 = arith.constant 0 : i32
    return %c0_i32, %c0_i32_0 : i32, i32
  }
  func.func @transform_2(%arg0: i32, %arg1: i32) -> (i32, i32) {
    %c0_i32 = arith.constant 0 : i32
    %c0_i32_0 = arith.constant 0 : i32
    %c0_i32_1 = arith.constant 0 : i32
    return %c0_i32, %c0_i32_0 : i32, i32
  }
  func.func @transform_3(%arg0: i32, %arg1: i32) -> (i32, i32, i32) {
    %c0_i32 = arith.constant 0 : i32
    %c0_i32_0 = arith.constant 0 : i32
    return %arg0, %c0_i32, %arg1 : i32, i32, i32
  }
}

</mosaic_0001>

<bundles_post_ra>
// kernel: tpu_custom_call.1
= control target key start
LH: loop header
LB: loop body
LE: loop exit
PB: predicated region body
PF: predicated region fallthrough
CT: control target
= control target key end

     0   :  { %8 = vsyncpa [#allocation3], 0  ;;  %s1274_s0 = inlined_call_operand.hbm [shape: f32[2,32,256], index: 0, kind: input, shape index: {}]   ;;  %s1275_s1 = inlined_call_operand.vmem [shape: f32[12,32], index: 1, kind: input, shape index: {}]   ;;  %s1276_s2 = inlined_call_operand.vmem [shape: f32[12,1], index: 2, kind: input, shape index: {}]   ;;  %s1277_s3 = inlined_call_operand.vmem [shape: f32[2,12,256], index: 3, kind: output, shape index: {}]  }
   0x1   :  { %10 = vsyncpa [#allocation3 + $0x1], 0  ;;  %s1056_s12 = smov 0   ;;  %s1058_s13 = smov 0  }
   0x2   :  { %s1060_s14 = smov 0   ;;  %s1062_s15 = smov 0  }
   0x3   :  { %s1064_s16 = smov 0   ;;  %s1066_s17 = smov 0  }
   0x4 LB: > { %s857_s18 = sadd.s32 4294967295, %s1031_s17   ;;  %s28_s19 = sadd.s32 1, %s1027_s16  ;;  %s1031_s17 = sphi %s1066_s17, %s16_s17   ;;  %s1027_s16 = sphi %s1064_s16, %s1284_s16   ;;  %s1023_s15 = sphi %s1062_s15, %s1283_s15   ;;  %s1019_s14 = sphi %s1060_s14, %s1282_s14   ;;  %s1015_s13 = sphi %s1058_s13, %s1281_s13   ;;  %s1011_s12 = sphi %s1056_s12, %s1280_s12  }
   0x5   : > { %p30_p0 = scmp.ge.s32.totalorder %s28_s19, 2  ;;  %s37_s20 = sadd.s32 1, %s1019_s14 }
   0x6   : > { %p44_p1 = scmp.ne.s32.totalorder %s1019_s14, %s1015_s13  ;;  %p45_p2 = scmp.eq.s32.totalorder %s1031_s17, 0 }
   0x7   : > { %s1286_s19 = smov (%p30_p0, %s28_s19), 0  ;;  %p50_p4 = scmp.ne.s32.totalorder %s1015_s13, %s1011_s12 }
   0x8   : > { %p1092_p3 = por %p45_p2, %p44_p1  ;;  %s32_s22 = ssub.s32 %s1027_s16, %s1286_s19 }
   0x9   : > { %p51_p5 = scmp.eq.s32.totalorder %s857_s18, 0  ;;  %p35_p6 = scmp.eq.s32.totalorder %s32_s22, 0 }
   0xa   : > { %p882_p8 = scmp.lt.s32.totalorder %s1031_s17, 2  ;;  %s150_s25 = sand.u32 1, %s1019_s14  }
   0xb   : > { %p1099_p7 = por %p51_p5, %p50_p4  ;;  %s874_s26 = sshll.u32 %s1027_s16, 6 }
   0xc   : > { %s1105_s24 = scalar_select %p35_p6, %s1019_s14, %s37_s20  }
   0xd   : > { %s861_s27 = sshll.u32 %s150_s25, 6  ;;  %s161_s30 = scalar_lea.hbm %s1274_s0, %s874_s26 }
   0xe   : > { %s162_s4 = sshll.u32 %s161_s30, 4  ;;  %s154_s5 = scalar_lea.vmem [#allocation2], %s861_s27  ;;  %s163_s4 = int_to_ptr.hbm [resolvable:$true] %s162_s4 }
   0xf   : > { %s164_s6 = sshll.u32 %s154_s5, 4  ;;  %p879_p9 = pnand %p882_p8, %p1092_p3  ;;  %s165_s6 = int_to_ptr.vmem [resolvable:$true] %s164_s6 }
  0x10   : > { %p864_p10 = scmp.ge.s32.totalorder %s1031_s17, 1  ;;  %p172_p11 = scmp.lt.s32.totalorder %s1031_s17, 3 }
  0x11   : > { %s151_s7 = scalar_lea.sflag [#allocation3], %s150_s25  ;;  %s1033_s8 = smov 256  }
  0x12   : > { %s1034_s9 = smov 16   ;;  %p173_p12 = pnand %p864_p10, %p172_p11 }
  0x13   : > { %881 = dma.hbm_to_vmem [thread:$0]  (!%p879_p9), %s163_s4, 1024, %s165_s6, %s151_s7, %s1033_s8, %s1033_s8, %s1034_s9  }
  0x14   : > { %176 = sbr.rel (%p173_p12) target bundleno = 245 (0xf5), region = 32  ;;  %s178_s10 = sand.u32 (!%p173_p12), 1, %s1015_s13  }
  0x15   : > { %s865_s11 = sshll.u32 (!%p173_p12), %s178_s10, 6  ;;  %s179_s12 = scalar_lea.sflag (!%p173_p12), [#allocation3], %s178_s10 }
  0x16   : > { %s1117_s18 = scalar_lea.vmem (!%p173_p12), [#allocation2], %s865_s11 }
  0x19   : > { %1006 = dma.done.wait (%p1099_p7), %s179_s12, 1024  }
  0x1a   : > { %1008 = vsyncadd (%p1099_p7), %s179_s12, 4294966272  ;;  %v1035_v0 = vmov 0   ;;  %vm243_vm0 = vcmask 261120   ;;  %v229_v1 = vld [vmem:[%s1117_s18 + $0x30] sm:$0xff]  ;;  %v227_v2 = vld [vmem:[%s1117_s18 + $0x20] sm:$0xff]  ;;  %p212_p13 = scmp.lt.s32.totalorder %s1023_s15, 1 }
  0x1b   : > { %934 = vset.pattern.permute.xlu0 %v1035_v0  ;;  %v225_v3 = vld [vmem:[%s1117_s18 + $0x10] sm:$0xff]  ;;  %v1126_v4 = vand.u32 4294901760, %v229_v1  ;;  %v1128_v5 = vand.u32 4294901760, %v227_v2  ;;  %v223_v7 = vld [vmem:[%s1117_s18] sm:$0xff]  ;;  %v230_v9 = vld [vmem:[%s1117_s18 + $0x38] sm:$0xff] }
  0x1c   : > { %v1130_v6 = vand.u32 4294901760, %v225_v3  ;;  %v221_v8 = vld [vmem:[%s1275_s1] sm:$0xff]  ;;  %v1137_v10 = vand.u32 4294901760, %v223_v7  ;;  %v1140_v12 = vand.u32 4294901760, %v230_v9  ;;  %v228_v13 = vld [vmem:[%s1117_s18 + $0x28] sm:$0xff]  ;;  %v226_v39 = vld [vmem:[%s1117_s18 + $0x18] sm:$0xff] }
  0x1d   : > { %v245_v11 = vsel %vm243_vm0, %v221_v8, 0  ;;  %v222_v14 = vld [vmem:[%s1275_s1 + $0x8] sm:$0xf]  ;;  %263 = vmatpush.msra.mxu0 %v1126_v4  ;;  %v300_v15 = vsub.f32 %v229_v1, %v1126_v4  ;;  %v306_v16 = vsub.f32 %v227_v2, %v1128_v5  ;;  %380 = vmatpush.msra.mxu3 %v1126_v4  ;;  %v231_v19 = vld [vmem:[%s1276_s2] sm:$0xff]  ;;  %v1164_v22 = vand.u32 4294901760, %v228_v13  ;;  %s1288_s15 = smov (!%p212_p13, %s1023_s15), 1 }
  0x1e   : > { %v1151_v17 = vsub.f32 %v225_v3, %v1130_v6  ;;  %v1153_v18 = vand.u32 4294901760, %v245_v11  ;;  %v1159_v20 = vsub.f32 %v223_v7, %v1137_v10  ;;  %v1162_v21 = vsub.f32 %v230_v9, %v1140_v12  ;;  %235 = vperm.xlu0 %934, %v231_v19   ;;  %v224_v40 = vld [vmem:[%s1117_s18 + $0x8] sm:$0xff]  ;;  %s875_s29 = sshll.u32 %s1288_s15, 5 }
  0x1f   : > { %v248_v23 = vsel %vm243_vm0, %v222_v14, 0  ;;  %265 = vmatpush.msra.mxu0 %v1128_v5  ;;  %346 = vmatpush.msra.mxu2 %v300_v15  ;;  %v301_v24 = vand.u32 4294901760, %v300_v15  ;;  %v307_v26 = vand.u32 4294901760, %v306_v16  ;;  %v1178_v31 = vsub.f32 %v228_v13, %v1164_v22  ;;  %v232_v0 = vld [vmem:[%s1276_s2 + $0x8] sm:$0xf]  ;;  %s1250_s5 = scalar_lea.vmem %s1277_s3, %s875_s29 }
  0x20   : > { %v1169_v25 = vsub.f32 %v245_v11, %v1153_v18  ;;  %v313_v27 = vand.u32 4294901760, %v1151_v17  ;;  %382 = vmatpush.msra.mxu3 %v1128_v5  ;;  %v517_v28 = vand.u32 4294901760, %v1162_v21  ;;  %v319_v29 = vand.u32 4294901760, %v1159_v20 }
  0x21   : > { %v1175_v30 = vand.u32 4294901760, %v248_v23  ;;  %267 = vmatpush.msra.mxu0 %v1130_v6  ;;  %349 = vmatpush.msra.mxu2 %v306_v16  ;;  %v302_v32 = vsub.f32 %v300_v15, %v301_v24  ;;  %v308_v34 = vsub.f32 %v306_v16, %v307_v26  ;;  %v523_v38 = vand.u32 4294901760, %v1178_v31 }
  0x22   : > { %v1182_v33 = vand.u32 4294901760, %v1169_v25  ;;  %v314_v35 = vsub.f32 %v1151_v17, %v313_v27  ;;  %384 = vmatpush.msra.mxu3 %v1130_v6  ;;  %v518_v36 = vsub.f32 %v1162_v21, %v517_v28  ;;  %v320_v44 = vsub.f32 %v1159_v20, %v319_v29 }
  0x23   : > { %v1190_v37 = vsub.f32 %v248_v23, %v1175_v30  ;;  %269 = vmatpush.msra.mxu0 %v1137_v10  ;;  %v303_v41 = vand.u32 4294901760, %v302_v32  ;;  %352 = vmatpush.msra.mxu2 %v1151_v17  ;;  %v309_v43 = vand.u32 4294901760, %v308_v34  ;;  %v524_v47 = vsub.f32 %v1178_v31, %v523_v38 }
  0x24   : > { %v273_v42 = vsub.f32 %v1169_v25, %v1182_v33  ;;  %386 = vmatpush.msra.mxu3 %v1137_v10  ;;  %v519_v45 = vand.u32 4294901760, %v518_v36  ;;  %v315_v49 = vand.u32 4294901760, %v314_v35  ;;  %v482_v50 = vand.u32 4294901760, %v226_v39 }
  0x25   : > { %415 = vmatpush.msrb.mxu0 %v301_v24  ;;  %v1202_v46 = vand.u32 4294901760, %v1190_v37  ;;  %304 = vmatpush.msra.mxu1 %v303_v41  ;;  %v484_v51 = vand.u32 4294901760, %v224_v40  ;;  %v525_v52 = vand.u32 4294901760, %v524_v47  ;;  %v321_v53 = vand.u32 4294901760, %v320_v44 }
  0x26   : > { %v274_v48 = vand.u32 4294901760, %v273_v42  ;;  %355 = vmatpush.msra.mxu2 %v1159_v20  ;;  %390 = vmatmul.f32.vlgmr.msra.gmra.mxu3 %v1182_v33  ;;  %v528_v55 = vsub.f32 %v226_v39, %v482_v50 }
  0x27   : > { %358 = vmatmul.f32.vlgmr.msra.gmra.mxu2 %v1169_v25  ;;  %310 = vmatpush.msra.mxu1 %v309_v43  ;;  %v281_v54 = vsub.f32 %v1190_v37, %v1202_v46  ;;  %v534_v56 = vsub.f32 %v224_v40, %v484_v51 }
  0x28   : > { %275 = vmatmul.f32.vlgmr.msra.gmra.mxu0 %v274_v48  ;;  %479 = vmatpush.msrb.mxu2 %v1140_v12  ;;  %v529_v57 = vand.u32 4294901760, %v528_v55 }
  0x29   : > { %520 = vmatpush.msrb.mxu3 %v519_v45  ;;  %316 = vmatpush.msra.mxu1 %v315_v49  ;;  %v535_v58 = vand.u32 4294901760, %v534_v56  ;;  %v282_v59 = vand.u32 4294901760, %v281_v54 }
  0x2a   : > { %419 = vmatpush.msrb.mxu0 %v307_v26  ;;  %481 = vmatpush.msrb.mxu2 %v1164_v22  ;;  %v530_v60 = vsub.f32 %v528_v55, %v529_v57 }
  0x2b   : > { %526 = vmatpush.msrb.mxu3 %v525_v52  ;;  %322 = vmatpush.msra.mxu1 %v321_v53  ;;  %v536_v61 = vsub.f32 %v534_v56, %v535_v58 }
  0x2c   : > { %423 = vmatpush.msrb.mxu0 %v313_v27  ;;  %324 = vmatmul.f32.vlgmr.msra.gmra.mxu1 %v1153_v18  ;;  %v531_v62 = vand.u32 4294901760, %v530_v60 }
  0x2d   : > { %483 = vmatpush.msrb.mxu2 %v482_v50  ;;  %450 = vmatpush.msrb.mxu1 %v1126_v4  ;;  %v537_v63 = vand.u32 4294901760, %v536_v61 }
  0x2e   : > { %427 = vmatpush.msrb.mxu0 %v319_v29  ;;  %396 = vmatmul.f32.gmra.mxu3 %v1202_v46 }
  0x2f   : > { %363 = vmatmul.f32.gmra.mxu2 %v1190_v37  ;;  %452 = vmatpush.msrb.mxu1 %v1128_v5 }
  0x30   : > { %283 = vmatmul.f32.gmra.mxu0 %v282_v59  ;;  %532 = vmatpush.msrb.mxu3 %v531_v62 }
  0x31   : > { %485 = vmatpush.msrb.mxu2 %v484_v51  ;;  %454 = vmatpush.msrb.mxu1 %v1130_v6 }
  0x32   : > { %538 = vmatpush.msrb.mxu3 %v537_v63  ;;  %562 = vmatpush.msra.mxu0 %v1162_v21 }
  0x33   : > { %631 = vmatpush.msra.mxu2 %v517_v28  ;;  %456 = vmatpush.msrb.mxu1 %v1137_v10 }
  0x34   : > { %666 = vmatpush.msra.mxu3 %v1140_v12  ;;  %328 = vmatmul.f32.gmra.mxu1 %v1175_v30 }
  0x35   : > { %635 = vmatpush.msra.mxu2 %v523_v38  ;;  %596 = vmatpush.msra.mxu1 %v1140_v12 }
  0x36   : > { %240 = vperm.xlu0 %934, %v232_v0   ;;  %540 = vmatmul.f32.vlgmr.msrb.gmra.mxu3 %v1153_v18 }
  0x37   : > { %491 = vmatmul.f32.vlgmr.msrb.gmra.mxu2 %v274_v48  ;;  %668 = vmatpush.msra.mxu3 %v1164_v22 }
  0x38   : > { %429 = vmatmul.f32.vlgmr.msrb.gmra.mxu0 %v1153_v18  ;;  %598 = vmatpush.msra.mxu1 %v1164_v22 }
  0x39   : > { %565 = vmatpush.msra.mxu0 %v1178_v31  ;;  %639 = vmatpush.msra.mxu2 %v529_v57 }
  0x3a   : > { %670 = vmatpush.msra.mxu3 %v482_v50  ;;  %600 = vmatpush.msra.mxu1 %v482_v50 }
  0x3b   : > { %568 = vmatpush.msra.mxu0 %v528_v55  ;;  %643 = vmatpush.msra.mxu2 %v535_v58 }
  0x3c   : > { %672 = vmatpush.msra.mxu3 %v484_v51  ;;  %458 = vmatmul.f32.vlgmr.msrb.gmra.mxu1 %v1153_v18 }
  0x3d   : > { %571 = vmatpush.msra.mxu0 %v534_v56  ;;  %602 = vmatpush.msra.mxu1 %v484_v51 }
  0x3e   : > { %544 = vmatmul.f32.gmra.mxu3 %v1175_v30 }
  0x3f   : > { %499 = vmatmul.f32.gmra.mxu2 %v282_v59 }
  0x40   : > { %433 = vmatmul.f32.gmra.mxu0 %v1175_v30 }
  0x44   : > { %462 = vmatmul.f32.gmra.mxu1 %v1175_v30 }
  0x46   : > { %674 = vmatmul.f32.vlgmr.msra.gmra.mxu3 %v1153_v18 }
  0x47   : > { %645 = vmatmul.f32.vlgmr.msra.gmra.mxu2 %v1153_v18 }
  0x48   : > { %574 = vmatmul.f32.vlgmr.msra.gmra.mxu0 %v1169_v25 }
  0x4c   : > { %606 = vmatmul.f32.vlgmr.msra.gmra.mxu1 %v1182_v33 }
  0x4e   : > { %678 = vmatmul.f32.gmra.mxu3 %v1175_v30 }
  0x4f   : > { %649 = vmatmul.f32.gmra.mxu2 %v1175_v30 }
  0x50   : > { %579 = vmatmul.f32.gmra.mxu0 %v1190_v37 }
  0x54   : > { %612 = vmatmul.f32.gmra.mxu1 %v1202_v46 }
  0x90   : > { %v236_v2 = vpop.permute.xlu0 %235 }
  0xa5   : > { %v276_v1 = vpop.f32.mrf.mxu0 }
  0xa6   : > { %v277_v5 = vadd.f32 %v276_v1, %v236_v2 }
  0xa8   : > { %v241_v9 = vpop.permute.xlu0 %240 }
  0xa9   : > { %v325_v3 = vpop.f32.mrf.mxu1  ;;  %v391_v6 = vpop.f32.mrf.mxu3 }
  0xaa   : > { %v359_v4 = vpop.f32.mrf.mxu2  ;;  %v326_v8 = vadd.f32 %v325_v3, %v277_v5 }
  0xac   : > { %v360_v12 = vadd.f32 %v359_v4, %v326_v8 }
  0xad   : > { %v284_v7 = vpop.f32.mrf.mxu0 }
  0xae   : > { %v285_v13 = vadd.f32 %v284_v7, %v241_v9  ;;  %v392_v16 = vadd.f32 %v391_v6, %v360_v12 }
  0xb1   : > { %v329_v10 = vpop.f32.mrf.mxu1  ;;  %v397_v14 = vpop.f32.mrf.mxu3 }
  0xb2   : > { %v364_v11 = vpop.f32.mrf.mxu2  ;;  %v330_v17 = vadd.f32 %v329_v10, %v285_v13 }
  0xb4   : > { %v365_v21 = vadd.f32 %v364_v11, %v330_v17 }
  0xb5   : > { %v430_v15 = vpop.f32.mrf.mxu0 }
  0xb6   : > { %v431_v18 = vadd.f32 %v430_v15, %v392_v16  ;;  %v398_v26 = vadd.f32 %v397_v14, %v365_v21 }
  0xb9   : > { %v459_v19 = vpop.f32.mrf.mxu1  ;;  %v541_v23 = vpop.f32.mrf.mxu3 }
  0xba   : > { %v492_v20 = vpop.f32.mrf.mxu2  ;;  %v460_v22 = vadd.f32 %v459_v19, %v431_v18 }
  0xbb   : > { %v493_v30 = vadd.f32 %v492_v20, %v236_v2 }
  0xbc   : > { %v868_v24 = vmul.f32 -1.442695, %v460_v22 }
  0xbd   : > { %v434_v25 = vpop.f32.mrf.mxu0  ;;  %v542_v37 = vadd.f32 %v541_v23, %v493_v30 }
  0xbe   : > { %935 = vpow2.f32 %v868_v24  ;;  %v435_v27 = vadd.f32 %v434_v25, %v398_v26 }
  0xc1   : > { %v463_v28 = vpop.f32.mrf.mxu1  ;;  %v545_v32 = vpop.f32.mrf.mxu3 }
  0xc2   : > { %v500_v29 = vpop.f32.mrf.mxu2  ;;  %v464_v31 = vadd.f32 %v463_v28, %v435_v27 }
  0xc3   : > { %v501_v41 = vadd.f32 %v500_v29, %v241_v9 }
  0xc4   : > { %v936_v33 = vpop.eup %935  ;;  %v870_v34 = vmul.f32 -1.442695, %v464_v31 }
  0xc5   : > { %v575_v35 = vpop.f32.mrf.mxu0  ;;  %v694_v36 = vadd.f32 1.0, %v936_v33  ;;  %v546_v50 = vadd.f32 %v545_v32, %v501_v41 }
  0xc6   : > { %937 = vpow2.f32 %v870_v34  ;;  %v576_v38 = vadd.f32 %v575_v35, %v542_v37 }
  0xc7   : > { %939 = vrcp.f32 %v694_v36  ;;  %v707_v55 = vand.u32 2147483647, %v694_v36  ;;  %v709_v56 = vand.u32 2147483648, %v694_v36  ;;  %vm703_vm2 = vweird.f32 %v694_v36 }
  0xc9   : > { %v607_v39 = vpop.f32.mrf.mxu1  ;;  %v675_v43 = vpop.f32.mrf.mxu3  ;;  %v710_v1 = vor.u32 1.1754944e-38, %v709_v56  ;;  %vm708_vm4 = vcmp.eq.f32.partialorder %v707_v55, 8.507059e+37 }
  0xca   : > { %v646_v40 = vpop.f32.mrf.mxu2  ;;  %v608_v42 = vadd.f32 %v607_v39, %v576_v38 }
  0xcc   : > { %v938_v44 = vpop.eup %937  ;;  %v647_v45 = vadd.f32 %v646_v40, %v608_v42 }
  0xcd   : > { %v940_v46 = vpop.eup %939  ;;  %v696_v47 = vadd.f32 1.0, %v938_v44  ;;  %v580_v48 = vpop.f32.mrf.mxu0 }
  0xce   : > { %v699_v49 = vmul.f32 %v940_v46, %v694_v36  ;;  %v676_v51 = vadd.f32 %v675_v43, %v647_v45  ;;  %v581_v53 = vadd.f32 %v580_v48, %v546_v50  ;;  %vm704_vm1 = vweird.f32 %v940_v46 }
  0xcf   : > { %941 = vrcp.f32 %v696_v47  ;;  %vm705_vm3 = vmor %vm703_vm2, %vm704_vm1  ;;  %v739_v9 = vand.u32 2147483648, %v696_v47  ;;  %v737_v12 = vand.u32 2147483647, %v696_v47  ;;  %vm733_vm6 = vweird.f32 %v696_v47 }
  0xd0   : > { %v700_v52 = vsub.f32 1.0, %v699_v49  ;;  %v869_v54 = vmul.f32 -1.442695, %v676_v51 }
  0xd1   : > { %v613_v57 = vpop.f32.mrf.mxu1  ;;  %v679_v61 = vpop.f32.mrf.mxu3  ;;  %v740_v14 = vor.u32 1.1754944e-38, %v739_v9  ;;  %vm738_vm8 = vcmp.eq.f32.partialorder %v737_v12, 8.507059e+37 }
  0xd2   : > { %v650_v58 = vpop.f32.mrf.mxu2  ;;  %v701_v59 = vmul.f32 %v940_v46, %v700_v52  ;;  %943 = vpow2.f32 %v869_v54  ;;  %v614_v60 = vadd.f32 %v613_v57, %v581_v53 }
  0xd4   : > { %v702_v62 = vadd.f32 %v940_v46, %v701_v59  ;;  %v651_v63 = vadd.f32 %v650_v58, %v614_v60 }
  0xd5   : > { %v942_v0 = vpop.eup %941 }
  0xd6   : > { %v706_v2 = vsel %vm705_vm3, %v940_v46, %v702_v62  ;;  %v729_v3 = vmul.f32 %v942_v0, %v696_v47  ;;  %v680_v4 = vadd.f32 %v679_v61, %v651_v63  ;;  %vm734_vm5 = vweird.f32 %v942_v0 }
  0xd7   : > { %v711_v5 = vsel %vm708_vm4, %v710_v1, %v706_v2  ;;  %vm735_vm7 = vmor %vm733_vm6, %vm734_vm5 }
  0xd8   : > { %v944_v6 = vpop.eup %943  ;;  %758 = vst [vmem:[%s1250_s5] sm:$0xff] %v711_v5  ;;  %v730_v7 = vsub.f32 1.0, %v729_v3  ;;  %v871_v8 = vmul.f32 -1.442695, %v680_v4 }
  0xd9   : > { %v695_v10 = vadd.f32 1.0, %v944_v6 }
  0xda   : > { %v731_v11 = vmul.f32 %v942_v0, %v730_v7  ;;  %945 = vpow2.f32 %v871_v8 }
  0xdb   : > { %947 = vrcp.f32 %v695_v10  ;;  %v724_v22 = vand.u32 2147483648, %v695_v10  ;;  %v722_v24 = vand.u32 2147483647, %v695_v10  ;;  %vm718_vm10 = vweird.f32 %v695_v10 }
  0xdc   : > { %v732_v13 = vadd.f32 %v942_v0, %v731_v11 }
  0xdd   : > { %v725_v27 = vor.u32 1.1754944e-38, %v724_v22  ;;  %vm723_vm12 = vcmp.eq.f32.partialorder %v722_v24, 8.507059e+37 }
  0xde   : > { %v736_v15 = vsel %vm735_vm7, %v942_v0, %v732_v13 }
  0xdf   : > { %v741_v16 = vsel %vm738_vm8, %v740_v14, %v736_v15 }
  0xe0   : > { %v946_v17 = vpop.eup %945  ;;  %760 = vst [vmem:[%s1250_s5 + $0x10] sm:$0xf] %v741_v16 }
  0xe1   : > { %v948_v18 = vpop.eup %947  ;;  %v697_v19 = vadd.f32 1.0, %v946_v17 }
  0xe2   : > { %v714_v20 = vmul.f32 %v948_v18, %v695_v10  ;;  %vm719_vm9 = vweird.f32 %v948_v18 }
  0xe3   : > { %949 = vrcp.f32 %v697_v19  ;;  %vm720_vm11 = vmor %vm718_vm10, %vm719_vm9  ;;  %v754_v32 = vand.u32 2147483648, %v697_v19  ;;  %v752_v34 = vand.u32 2147483647, %v697_v19  ;;  %vm748_vm14 = vweird.f32 %v697_v19 }
  0xe4   : > { %v715_v21 = vsub.f32 1.0, %v714_v20 }
  0xe5   : > { %v755_v36 = vor.u32 1.1754944e-38, %v754_v32  ;;  %vm753_vm0 = vcmp.eq.f32.partialorder %v752_v34, 8.507059e+37 }
  0xe6   : > { %v716_v23 = vmul.f32 %v948_v18, %v715_v21 }
  0xe8   : > { %v717_v25 = vadd.f32 %v948_v18, %v716_v23 }
  0xe9   : > { %v950_v26 = vpop.eup %949 }
  0xea   : > { %v721_v28 = vsel %vm720_vm11, %v948_v18, %v717_v25  ;;  %v744_v29 = vmul.f32 %v950_v26, %v697_v19  ;;  %vm749_vm13 = vweird.f32 %v950_v26 }
  0xeb   : > { %v726_v30 = vsel %vm723_vm12, %v725_v27, %v721_v28  ;;  %vm750_vm15 = vmor %vm748_vm14, %vm749_vm13 }
  0xec   : > { %759 = vst [vmem:[%s1250_s5 + $0x8] sm:$0xff] %v726_v30  ;;  %v745_v31 = vsub.f32 1.0, %v744_v29 }
  0xee   : > { %v746_v33 = vmul.f32 %v950_v26, %v745_v31 }
  0xf0   : > { %v747_v35 = vadd.f32 %v950_v26, %v746_v33 }
  0xf2   : > { %v751_v37 = vsel %vm750_vm15, %v950_v26, %v747_v35 }
  0xf3   : > { %v756_v38 = vsel %vm753_vm0, %v755_v36, %v751_v37 }
  0xf4   : > { %761 = vst [vmem:[%s1250_s5 + $0x18] sm:$0xf] %v756_v38 }
  0xf5 PF: > { %s16_s17 = sadd.s32 1, %s1031_s17   ;;  %s1280_s12 = smov %s1015_s13 }
  0xf6   : > { %p13_p0 = scmp.ge.s32.totalorder %s16_s17, 4   ;;  %s1281_s13 = smov %s1019_s14 }
  0xf7   : > { %s1282_s14 = smov %s1105_s24  ;;  %s1283_s15 = smov %s1027_s16 }
  0xf8   : > { %s1284_s16 = smov %s1286_s19  ;;  %15 = sbr.rel (!%p13_p0) target bundleno = 4 (0x4), region = 72 }
  0xfd   :  { %792 = vsyncpa [#allocation3], 1 }
  0xfe   :  { %794 = vsyncpa [#allocation3 + $0x1], 1 }

</bundles_post_ra>
